<compile_context>
chip_gen: v7x
topology: tpu7x:2x2x1
jax: 0.10.0
libtpu: 0.0.40
codegen_flags: <defaults>
</compile_context>

<pallas_src>
import functools

import jax
import jax.numpy as jnp
from jax.experimental import pallas as pl
from jax.experimental.pallas import tpu as pltpu


def _round_up(x, m):
    return (x + m - 1) // m * m


def tensor_reshape(x):
    if x.ndim == 2:
        return x.reshape(-1, 1, x.shape[-1])
    elif x.ndim == 3:
        return x.reshape(-1, x.shape[-1])
    return x


# ----------------------------------------------------------------------------
# Fused kernel
# ----------------------------------------------------------------------------
def _mlp_block(x, w_ref, b_ref, g_ref, bt_ref, alpha, residual=None):
    """PReLU(LayerNorm(x @ W + b)) [+ residual].  bf16 MXU operands, f32 math."""
    y = jnp.dot(x.astype(jnp.bfloat16), w_ref[...],
                preferred_element_type=jnp.float32)
    y = y + b_ref[...]                                        # bias [1, out]
    # Fused LayerNorm stats: two independent reductions, var = E[y^2] - mean^2
    mean = jnp.mean(y, axis=-1, keepdims=True)
    mean_sq = jnp.mean(y * y, axis=-1, keepdims=True)
    var = jnp.maximum(mean_sq - mean * mean, 0.0)
    y = (y - mean) * jax.lax.rsqrt(var + 1e-5)
    y = y * g_ref[...] + bt_ref[...]
    y = jnp.where(y >= 0.0, y, alpha * y)                     # PReLU (shared alpha)
    if residual is not None:
        y = y + residual
    return y


def autoencoder_kernel(
    x_ref,                                   # [TN, input_dim] bf16
    e0_w, e0_b, e0_g, e0_bt,                 # encoder layer 0
    e1_w, e1_b, e1_g, e1_bt,                 # encoder layer 1 (+ residual)
    eo_w, eo_b,                              # encoder output linear
    d0_w, d0_b, d0_g, d0_bt,                 # decoder layer 0
    d1_w, d1_b, d1_g, d1_bt,                 # decoder layer 1 (+ residual)
    do_w, do_b,                              # decoder output linear
    alphas,                                  # SMEM f32[4]: PReLU a (e0,e1,d0,d1)
    lat_ref,                                 # [TN, latent_dim] f32
    rec_ref,                                 # [TN, input_dim]  f32
):
    x = x_ref[...]                           # already bf16

    # ---- Encoder_cfg ----
    h = _mlp_block(x, e0_w, e0_b, e0_g, e0_bt, alphas[0])
    h = _mlp_block(h, e1_w, e1_b, e1_g, e1_bt, alphas[1], residual=h)
    lat = jnp.dot(h.astype(jnp.bfloat16), eo_w[...],
                  preferred_element_type=jnp.float32) + eo_b[...]
    # F.normalize(p=2, dim=1): x / max(||x||, 1e-12) == x * rsqrt(max(||x||^2, 1e-24))
    ss = jnp.sum(lat * lat, axis=-1, keepdims=True)
    lat = lat * jax.lax.rsqrt(jnp.maximum(ss, 1e-24))
    lat_ref[...] = lat

    # ---- Decoder_cfg ----
    d = _mlp_block(lat, d0_w, d0_b, d0_g, d0_bt, alphas[2])
    d = _mlp_block(d, d1_w, d1_b, d1_g, d1_bt, alphas[3], residual=d)
    rec_ref[...] = jnp.dot(d.astype(jnp.bfloat16), do_w[...],
                           preferred_element_type=jnp.float32) + do_b[...]


# ----------------------------------------------------------------------------
# Parameters (mimic nn.Linear / LayerNorm / PReLU init; stored pre-transposed
# [in, out], bf16 weights, (1, out) f32 bias/gamma/beta).  Exact widths — no
# lane padding needed (full-dim BlockSpec rule + masked stores).
# ----------------------------------------------------------------------------
def build_autoencoder_params(key, input_dim, hidden_dim, latent_dim):
    assert len(hidden_dim) == 2 and hidden_dim[0] == hidden_dim[1], (
        "fused kernel mirrors the default 2-layer, equal-width config "
        "(residual on layer 1)")
    h0, h1 = hidden_dim
    keys = jax.random.split(key, 6)

    def linear(k, d_in, d_out):
        kw, kb = jax.random.split(k)
        bound = 1.0 / float(d_in) ** 0.5
        w = jax.random.uniform(kw, (d_in, d_out), jnp.float32, -bound, bound)
        b = jax.random.uniform(kb, (1, d_out), jnp.float32, -bound, bound)
        return w.astype(jnp.bfloat16), b

    def mlp(k, d_in, d_out):
        w, b = linear(k, d_in, d_out)
        return dict(w=w, b=b,
                    g=jnp.ones((1, d_out), jnp.float32),
                    beta=jnp.zeros((1, d_out), jnp.float32))

    return dict(
        enc0=mlp(keys[0], input_dim, h0),
        enc1=mlp(keys[1], h0, h1),
        enc_out=dict(zip(("w", "b"), linear(keys[2], h1, latent_dim))),
        dec0=mlp(keys[3], latent_dim, h0),
        dec1=mlp(keys[4], h0, h1),
        dec_out=dict(zip(("w", "b"), linear(keys[5], h1, input_dim))),
        alphas=jnp.full((4,), 0.25, jnp.float32),       # PReLU init, one per layer
    )


def _pick_tile_n(n):
    """Row tile: as large as reasonable (<=2048), but split so the parallel
    row axis has >=2 grid steps when possible (v7x dual-TC / megacore)."""
    n8 = _round_up(n, 8)
    half = _round_up(-(-n8 // 2), 8)        # ceil(n8/2) rounded up to 8
    return max(8, min(2048, half))


# ----------------------------------------------------------------------------
# Forward: AutoEncoder(cfg=True, residual=True, reshape=True), eval mode
# ----------------------------------------------------------------------------
@functools.partial(jax.jit, static_argnames=("input_dim", "latent_dim"))
def autoencoder_forward(params, x, y, *, input_dim, latent_dim):
    del y  # cfg=True: labels / y_embedder unused in forward
    x2 = tensor_reshape(x)                               # [N, input_dim]
    n = x2.shape[0]
    assert x2.shape[-1] == input_dim

    # MXU consumes bf16 anyway -> feed bf16, halving input-side HBM read bytes.
    x_bf16 = x2.astype(jnp.bfloat16)

    tile_n = _pick_tile_n(n)
    grid = (pl.cdiv(n, tile_n),)             # ragged last tile handled by masking

    def act_spec(d):
        return pl.BlockSpec((tile_n, d), lambda i: (i, 0))

    def const_spec(a):                       # weights stay resident (constant map)
        zeros = (0,) * a.ndim
        return pl.BlockSpec(a.shape, lambda i: zeros)

    weight_args = []
    for name in ("enc0", "enc1"):
        p = params[name]
        weight_args += [p["w"], p["b"], p["g"], p["beta"]]
    weight_args += [params["enc_out"]["w"], params["enc_out"]["b"]]
    for name in ("dec0", "dec1"):
        p = params[name]
        weight_args += [p["w"], p["b"], p["g"], p["beta"]]
    weight_args += [params["dec_out"]["w"], params["dec_out"]["b"]]

    latent, recon = pl.pallas_call(
        autoencoder_kernel,
        out_shape=(jax.ShapeDtypeStruct((n, latent_dim), jnp.float32),
                   jax.ShapeDtypeStruct((n, input_dim), jnp.float32)),
        grid_spec=pltpu.PrefetchScalarGridSpec(
            num_scalar_prefetch=0,
            grid=grid,
            in_specs=[act_spec(input_dim)]
                     + [const_spec(a) for a in weight_args]
                     + [pl.BlockSpec(memory_space=pltpu.MemorySpace.SMEM)],
            out_specs=[act_spec(latent_dim), act_spec(input_dim)],
        ),
        compiler_params=pltpu.CompilerParams(
            dimension_semantics=("parallel",),
            vmem_limit_bytes=32 * 1024 * 1024),
    )(x_bf16, *weight_args, params["alphas"])

    # Outputs are exact-width -> no slicing passes; just the cheap reshape.
    return tensor_reshape(latent), tensor_reshape(recon)   # [N,1,lat], [N,1,in]


# ----------------------------------------------------------------------------
if __name__ == "__main__":
    B, S = 2, 4                   # tensor_reshape flattens to N = 8 rows
    INPUT_DIM = 64
    HIDDEN_DIM = [128, 128]
    LATENT_DIM = 32

    root = jax.random.PRNGKey(0)
    k_params, k_x, k_y = jax.random.split(root, 3)

    params = build_autoencoder_params(k_params, INPUT_DIM, HIDDEN_DIM, LATENT_DIM)
    x = jax.random.normal(k_x, (B, S, INPUT_DIM), jnp.float32)
    y = jax.random.randint(k_y, (B * S,), 0, 100, jnp.int32)  # unused (cfg=True)

    latent, recon = autoencoder_forward(params, x, y,
                                        input_dim=INPUT_DIM,
                                        latent_dim=LATENT_DIM)
    jax.block_until_ready((latent, recon))

    assert latent.shape == (B * S, 1, LATENT_DIM), latent.shape
    assert recon.shape == (B * S, 1, INPUT_DIM), recon.shape
    assert bool(jnp.all(jnp.isfinite(latent))) and bool(jnp.all(jnp.isfinite(recon)))
    # encoder output is L2-normalized along dim 1
    norms = jnp.linalg.norm(latent.reshape(B * S, LATENT_DIM), axis=1)
    assert bool(jnp.allclose(norms, 1.0, atol=1e-4)), norms

    print("KERNEL_OK")
</pallas_src>

<mosaic_0001>
module attributes {stable_mosaic.version = 11 : i64} {
  func.func @autoencoder_kernel(%arg0: i32, %arg1: memref<8x64xbf16, #tpu.memory_space<vmem>>, %arg2: memref<64x128xbf16, #tpu.memory_space<vmem>>, %arg3: memref<1x128xf32, #tpu.memory_space<vmem>>, %arg4: memref<1x128xf32, #tpu.memory_space<vmem>>, %arg5: memref<1x128xf32, #tpu.memory_space<vmem>>, %arg6: memref<128x128xbf16, #tpu.memory_space<vmem>>, %arg7: memref<1x128xf32, #tpu.memory_space<vmem>>, %arg8: memref<1x128xf32, #tpu.memory_space<vmem>>, %arg9: memref<1x128xf32, #tpu.memory_space<vmem>>, %arg10: memref<128x32xbf16, #tpu.memory_space<vmem>>, %arg11: memref<1x32xf32, #tpu.memory_space<vmem>>, %arg12: memref<32x128xbf16, #tpu.memory_space<vmem>>, %arg13: memref<1x128xf32, #tpu.memory_space<vmem>>, %arg14: memref<1x128xf32, #tpu.memory_space<vmem>>, %arg15: memref<1x128xf32, #tpu.memory_space<vmem>>, %arg16: memref<128x128xbf16, #tpu.memory_space<vmem>>, %arg17: memref<1x128xf32, #tpu.memory_space<vmem>>, %arg18: memref<1x128xf32, #tpu.memory_space<vmem>>, %arg19: memref<1x128xf32, #tpu.memory_space<vmem>>, %arg20: memref<128x64xbf16, #tpu.memory_space<vmem>>, %arg21: memref<1x64xf32, #tpu.memory_space<vmem>>, %arg22: memref<4xf32, #tpu.memory_space<smem>>, %arg23: memref<8x32xf32, #tpu.memory_space<vmem>>, %arg24: memref<8x64xf32, #tpu.memory_space<vmem>>) attributes {dimension_semantics = [#tpu.dimension_semantics<parallel>], iteration_bounds = array<i64: 1>, scalar_prefetch = 0 : i64, scratch_operands = 0 : i64, tpu.core_type = #tpu.core_type<tc>, window_params = [{transform_indices = @transform_0, window_bounds = array<i64: 8, 64>}, {pipeline_mode = #tpu.pipeline_mode<synchronous>, transform_indices = @transform_1, window_bounds = array<i64: 64, 128>}, {pipeline_mode = #tpu.pipeline_mode<synchronous>, transform_indices = @transform_2, window_bounds = array<i64: 1, 128>}, {pipeline_mode = #tpu.pipeline_mode<synchronous>, transform_indices = @transform_3, window_bounds = array<i64: 1, 128>}, {pipeline_mode = #tpu.pipeline_mode<synchronous>, transform_indices = @transform_4, window_bounds = array<i64: 1, 128>}, {pipeline_mode = #tpu.pipeline_mode<synchronous>, transform_indices = @transform_5, window_bounds = array<i64: 128, 128>}, {pipeline_mode = #tpu.pipeline_mode<synchronous>, transform_indices = @transform_6, window_bounds = array<i64: 1, 128>}, {pipeline_mode = #tpu.pipeline_mode<synchronous>, transform_indices = @transform_7, window_bounds = array<i64: 1, 128>}, {pipeline_mode = #tpu.pipeline_mode<synchronous>, transform_indices = @transform_8, window_bounds = array<i64: 1, 128>}, {pipeline_mode = #tpu.pipeline_mode<synchronous>, transform_indices = @transform_9, window_bounds = array<i64: 128, 32>}, {pipeline_mode = #tpu.pipeline_mode<synchronous>, transform_indices = @transform_10, window_bounds = array<i64: 1, 32>}, {pipeline_mode = #tpu.pipeline_mode<synchronous>, transform_indices = @transform_11, window_bounds = array<i64: 32, 128>}, {pipeline_mode = #tpu.pipeline_mode<synchronous>, transform_indices = @transform_12, window_bounds = array<i64: 1, 128>}, {pipeline_mode = #tpu.pipeline_mode<synchronous>, transform_indices = @transform_13, window_bounds = array<i64: 1, 128>}, {pipeline_mode = #tpu.pipeline_mode<synchronous>, transform_indices = @transform_14, window_bounds = array<i64: 1, 128>}, {pipeline_mode = #tpu.pipeline_mode<synchronous>, transform_indices = @transform_15, window_bounds = array<i64: 128, 128>}, {pipeline_mode = #tpu.pipeline_mode<synchronous>, transform_indices = @transform_16, window_bounds = array<i64: 1, 128>}, {pipeline_mode = #tpu.pipeline_mode<synchronous>, transform_indices = @transform_17, window_bounds = array<i64: 1, 128>}, {pipeline_mode = #tpu.pipeline_mode<synchronous>, transform_indices = @transform_18, window_bounds = array<i64: 1, 128>}, {pipeline_mode = #tpu.pipeline_mode<synchronous>, transform_indices = @transform_19, window_bounds = array<i64: 128, 64>}, {pipeline_mode = #tpu.pipeline_mode<synchronous>, transform_indices = @transform_20, window_bounds = array<i64: 1, 64>}, {transform_indices = @transform_21, window_bounds = array<i64: 4>}, {transform_indices = @transform_22, window_bounds = array<i64: 8, 32>}, {transform_indices = @transform_23, window_bounds = array<i64: 8, 64>}]} {
    %c0 = arith.constant 0 : index
    %c0_0 = arith.constant 0 : index
    %0 = vector.load %arg1[%c0, %c0_0] : memref<8x64xbf16, #tpu.memory_space<vmem>>, vector<8x64xbf16>
    %c0_1 = arith.constant 0 : index
    %1 = memref.load %arg22[%c0_1] : memref<4xf32, #tpu.memory_space<smem>>
    %c0_2 = arith.constant 0 : index
    %c0_3 = arith.constant 0 : index
    %2 = vector.load %arg2[%c0_2, %c0_3] : memref<64x128xbf16, #tpu.memory_space<vmem>>, vector<64x128xbf16>
    %cst = arith.constant dense<0.000000e+00> : vector<8x128xf32>
    %3 = tpu.matmul %0, %2, %cst {dimension_numbers = #tpu.dot_dimension_numbers<[1], [0], [0], [1], [0, 0, 1, 1], [], []>} : vector<8x64xbf16>, vector<64x128xbf16>, vector<8x128xf32> -> vector<8x128xf32>
    %c0_4 = arith.constant 0 : index
    %c0_5 = arith.constant 0 : index
    %4 = vector.load %arg3[%c0_4, %c0_5] : memref<1x128xf32, #tpu.memory_space<vmem>>, vector<1x128xf32>
    %5 = vector.broadcast %4 : vector<1x128xf32> to vector<8x128xf32>
    %6 = arith.addf %3, %5 : vector<8x128xf32>
    %cst_6 = arith.constant dense<0.000000e+00> : vector<8xf32>
    %7 = vector.multi_reduction <add>, %6, %cst_6 [1] : vector<8x128xf32> to vector<8xf32>
    %8 = vector.shape_cast %7 : vector<8xf32> to vector<8x1xf32>
    %cst_7 = arith.constant 1.280000e+02 : f32
    %9 = vector.broadcast %cst_7 : f32 to vector<8x1xf32>
    %10 = arith.divf %8, %9 : vector<8x1xf32>
    %11 = arith.mulf %6, %6 : vector<8x128xf32>
    %cst_8 = arith.constant dense<0.000000e+00> : vector<8xf32>
    %12 = vector.multi_reduction <add>, %11, %cst_8 [1] : vector<8x128xf32> to vector<8xf32>
    %13 = vector.shape_cast %12 : vector<8xf32> to vector<8x1xf32>
    %cst_9 = arith.constant 1.280000e+02 : f32
    %14 = vector.broadcast %cst_9 : f32 to vector<8x1xf32>
    %15 = arith.divf %13, %14 : vector<8x1xf32>
    %16 = arith.mulf %10, %10 : vector<8x1xf32>
    %17 = arith.subf %15, %16 : vector<8x1xf32>
    %cst_10 = arith.constant 0.000000e+00 : f32
    %18 = vector.broadcast %cst_10 : f32 to vector<8x1xf32>
    %19 = arith.maximumf %17, %18 : vector<8x1xf32>
    %20 = vector.broadcast %10 : vector<8x1xf32> to vector<8x128xf32>
    %21 = arith.subf %6, %20 : vector<8x128xf32>
    %cst_11 = arith.constant 9.99999974E-6 : f32
    %22 = vector.broadcast %cst_11 : f32 to vector<8x1xf32>
    %23 = arith.addf %19, %22 : vector<8x1xf32>
    %24 = math.rsqrt %23 : vector<8x1xf32>
    %25 = vector.broadcast %24 : vector<8x1xf32> to vector<8x128xf32>
    %26 = arith.mulf %21, %25 : vector<8x128xf32>
    %c0_12 = arith.constant 0 : index
    %c0_13 = arith.constant 0 : index
    %27 = vector.load %arg4[%c0_12, %c0_13] : memref<1x128xf32, #tpu.memory_space<vmem>>, vector<1x128xf32>
    %28 = vector.broadcast %27 : vector<1x128xf32> to vector<8x128xf32>
    %29 = arith.mulf %26, %28 : vector<8x128xf32>
    %c0_14 = arith.constant 0 : index
    %c0_15 = arith.constant 0 : index
    %30 = vector.load %arg5[%c0_14, %c0_15] : memref<1x128xf32, #tpu.memory_space<vmem>>, vector<1x128xf32>
    %31 = vector.broadcast %30 : vector<1x128xf32> to vector<8x128xf32>
    %32 = arith.addf %29, %31 : vector<8x128xf32>
    %cst_16 = arith.constant 0.000000e+00 : f32
    %33 = vector.broadcast %cst_16 : f32 to vector<8x128xf32>
    %34 = arith.cmpf oge, %32, %33 : vector<8x128xf32>
    %35 = vector.broadcast %1 : f32 to vector<8x128xf32>
    %36 = arith.mulf %35, %32 : vector<8x128xf32>
    %37 = arith.select %34, %32, %36 : vector<8x128xi1>, vector<8x128xf32>
    %c1 = arith.constant 1 : index
    %38 = memref.load %arg22[%c1] : memref<4xf32, #tpu.memory_space<smem>>
    %39 = arith.truncf %37 : vector<8x128xf32> to vector<8x128xbf16>
    %c0_17 = arith.constant 0 : index
    %c0_18 = arith.constant 0 : index
    %40 = vector.load %arg6[%c0_17, %c0_18] : memref<128x128xbf16, #tpu.memory_space<vmem>>, vector<128x128xbf16>
    %cst_19 = arith.constant dense<0.000000e+00> : vector<8x128xf32>
    %41 = tpu.matmul %39, %40, %cst_19 {dimension_numbers = #tpu.dot_dimension_numbers<[1], [0], [0], [1], [0, 0, 1, 1], [], []>} : vector<8x128xbf16>, vector<128x128xbf16>, vector<8x128xf32> -> vector<8x128xf32>
    %c0_20 = arith.constant 0 : index
    %c0_21 = arith.constant 0 : index
    %42 = vector.load %arg7[%c0_20, %c0_21] : memref<1x128xf32, #tpu.memory_space<vmem>>, vector<1x128xf32>
    %43 = vector.broadcast %42 : vector<1x128xf32> to vector<8x128xf32>
    %44 = arith.addf %41, %43 : vector<8x128xf32>
    %cst_22 = arith.constant dense<0.000000e+00> : vector<8xf32>
    %45 = vector.multi_reduction <add>, %44, %cst_22 [1] : vector<8x128xf32> to vector<8xf32>
    %46 = vector.shape_cast %45 : vector<8xf32> to vector<8x1xf32>
    %cst_23 = arith.constant 1.280000e+02 : f32
    %47 = vector.broadcast %cst_23 : f32 to vector<8x1xf32>
    %48 = arith.divf %46, %47 : vector<8x1xf32>
    %49 = arith.mulf %44, %44 : vector<8x128xf32>
    %cst_24 = arith.constant dense<0.000000e+00> : vector<8xf32>
    %50 = vector.multi_reduction <add>, %49, %cst_24 [1] : vector<8x128xf32> to vector<8xf32>
    %51 = vector.shape_cast %50 : vector<8xf32> to vector<8x1xf32>
    %cst_25 = arith.constant 1.280000e+02 : f32
    %52 = vector.broadcast %cst_25 : f32 to vector<8x1xf32>
    %53 = arith.divf %51, %52 : vector<8x1xf32>
    %54 = arith.mulf %48, %48 : vector<8x1xf32>
    %55 = arith.subf %53, %54 : vector<8x1xf32>
    %cst_26 = arith.constant 0.000000e+00 : f32
    %56 = vector.broadcast %cst_26 : f32 to vector<8x1xf32>
    %57 = arith.maximumf %55, %56 : vector<8x1xf32>
    %58 = vector.broadcast %48 : vector<8x1xf32> to vector<8x128xf32>
    %59 = arith.subf %44, %58 : vector<8x128xf32>
    %cst_27 = arith.constant 9.99999974E-6 : f32
    %60 = vector.broadcast %cst_27 : f32 to vector<8x1xf32>
    %61 = arith.addf %57, %60 : vector<8x1xf32>
    %62 = math.rsqrt %61 : vector<8x1xf32>
    %63 = vector.broadcast %62 : vector<8x1xf32> to vector<8x128xf32>
    %64 = arith.mulf %59, %63 : vector<8x128xf32>
    %c0_28 = arith.constant 0 : index
    %c0_29 = arith.constant 0 : index
    %65 = vector.load %arg8[%c0_28, %c0_29] : memref<1x128xf32, #tpu.memory_space<vmem>>, vector<1x128xf32>
    %66 = vector.broadcast %65 : vector<1x128xf32> to vector<8x128xf32>
    %67 = arith.mulf %64, %66 : vector<8x128xf32>
    %c0_30 = arith.constant 0 : index
    %c0_31 = arith.constant 0 : index
    %68 = vector.load %arg9[%c0_30, %c0_31] : memref<1x128xf32, #tpu.memory_space<vmem>>, vector<1x128xf32>
    %69 = vector.broadcast %68 : vector<1x128xf32> to vector<8x128xf32>
    %70 = arith.addf %67, %69 : vector<8x128xf32>
    %cst_32 = arith.constant 0.000000e+00 : f32
    %71 = vector.broadcast %cst_32 : f32 to vector<8x128xf32>
    %72 = arith.cmpf oge, %70, %71 : vector<8x128xf32>
    %73 = vector.broadcast %38 : f32 to vector<8x128xf32>
    %74 = arith.mulf %73, %70 : vector<8x128xf32>
    %75 = arith.select %72, %70, %74 : vector<8x128xi1>, vector<8x128xf32>
    %76 = arith.addf %75, %37 : vector<8x128xf32>
    %77 = arith.truncf %76 : vector<8x128xf32> to vector<8x128xbf16>
    %c0_33 = arith.constant 0 : index
    %c0_34 = arith.constant 0 : index
    %78 = vector.load %arg10[%c0_33, %c0_34] : memref<128x32xbf16, #tpu.memory_space<vmem>>, vector<128x32xbf16>
    %cst_35 = arith.constant dense<0.000000e+00> : vector<8x32xf32>
    %79 = tpu.matmul %77, %78, %cst_35 {dimension_numbers = #tpu.dot_dimension_numbers<[1], [0], [0], [1], [0, 0, 1, 1], [], []>} : vector<8x128xbf16>, vector<128x32xbf16>, vector<8x32xf32> -> vector<8x32xf32>
    %c0_36 = arith.constant 0 : index
    %c0_37 = arith.constant 0 : index
    %80 = vector.load %arg11[%c0_36, %c0_37] : memref<1x32xf32, #tpu.memory_space<vmem>>, vector<1x32xf32>
    %81 = vector.broadcast %80 : vector<1x32xf32> to vector<8x32xf32>
    %82 = arith.addf %79, %81 : vector<8x32xf32>
    %83 = arith.mulf %82, %82 : vector<8x32xf32>
    %cst_38 = arith.constant dense<0.000000e+00> : vector<8xf32>
    %84 = vector.multi_reduction <add>, %83, %cst_38 [1] : vector<8x32xf32> to vector<8xf32>
    %85 = vector.shape_cast %84 : vector<8xf32> to vector<8x1xf32>
    %cst_39 = arith.constant 1.000000e-24 : f32
    %86 = vector.broadcast %cst_39 : f32 to vector<8x1xf32>
    %87 = arith.maximumf %85, %86 : vector<8x1xf32>
    %88 = math.rsqrt %87 : vector<8x1xf32>
    %89 = vector.broadcast %88 : vector<8x1xf32> to vector<8x32xf32>
    %90 = arith.mulf %82, %89 : vector<8x32xf32>
    %c0_40 = arith.constant 0 : index
    %c0_41 = arith.constant 0 : index
    %91 = vector.load %arg23[%c0_40, %c0_41] : memref<8x32xf32, #tpu.memory_space<vmem>>, vector<8x32xf32>
    tpu.vector_store %arg23[%c0_40, %c0_41], %90 {strides = array<i32>} : memref<8x32xf32, #tpu.memory_space<vmem>>, vector<8x32xf32>,
    %c2 = arith.constant 2 : index
    %92 = memref.load %arg22[%c2] : memref<4xf32, #tpu.memory_space<smem>>
    %93 = arith.truncf %90 : vector<8x32xf32> to vector<8x32xbf16>
    %c0_42 = arith.constant 0 : index
    %c0_43 = arith.constant 0 : index
    %94 = vector.load %arg12[%c0_42, %c0_43] : memref<32x128xbf16, #tpu.memory_space<vmem>>, vector<32x128xbf16>
    %cst_44 = arith.constant dense<0.000000e+00> : vector<8x128xf32>
    %95 = tpu.matmul %93, %94, %cst_44 {dimension_numbers = #tpu.dot_dimension_numbers<[1], [0], [0], [1], [0, 0, 1, 1], [], []>} : vector<8x32xbf16>, vector<32x128xbf16>, vector<8x128xf32> -> vector<8x128xf32>
    %c0_45 = arith.constant 0 : index
    %c0_46 = arith.constant 0 : index
    %96 = vector.load %arg13[%c0_45, %c0_46] : memref<1x128xf32, #tpu.memory_space<vmem>>, vector<1x128xf32>
    %97 = vector.broadcast %96 : vector<1x128xf32> to vector<8x128xf32>
    %98 = arith.addf %95, %97 : vector<8x128xf32>
    %cst_47 = arith.constant dense<0.000000e+00> : vector<8xf32>
    %99 = vector.multi_reduction <add>, %98, %cst_47 [1] : vector<8x128xf32> to vector<8xf32>
    %100 = vector.shape_cast %99 : vector<8xf32> to vector<8x1xf32>
    %cst_48 = arith.constant 1.280000e+02 : f32
    %101 = vector.broadcast %cst_48 : f32 to vector<8x1xf32>
    %102 = arith.divf %100, %101 : vector<8x1xf32>
    %103 = arith.mulf %98, %98 : vector<8x128xf32>
    %cst_49 = arith.constant dense<0.000000e+00> : vector<8xf32>
    %104 = vector.multi_reduction <add>, %103, %cst_49 [1] : vector<8x128xf32> to vector<8xf32>
    %105 = vector.shape_cast %104 : vector<8xf32> to vector<8x1xf32>
    %cst_50 = arith.constant 1.280000e+02 : f32
    %106 = vector.broadcast %cst_50 : f32 to vector<8x1xf32>
    %107 = arith.divf %105, %106 : vector<8x1xf32>
    %108 = arith.mulf %102, %102 : vector<8x1xf32>
    %109 = arith.subf %107, %108 : vector<8x1xf32>
    %cst_51 = arith.constant 0.000000e+00 : f32
    %110 = vector.broadcast %cst_51 : f32 to vector<8x1xf32>
    %111 = arith.maximumf %109, %110 : vector<8x1xf32>
    %112 = vector.broadcast %102 : vector<8x1xf32> to vector<8x128xf32>
    %113 = arith.subf %98, %112 : vector<8x128xf32>
    %cst_52 = arith.constant 9.99999974E-6 : f32
    %114 = vector.broadcast %cst_52 : f32 to vector<8x1xf32>
    %115 = arith.addf %111, %114 : vector<8x1xf32>
    %116 = math.rsqrt %115 : vector<8x1xf32>
    %117 = vector.broadcast %116 : vector<8x1xf32> to vector<8x128xf32>
    %118 = arith.mulf %113, %117 : vector<8x128xf32>
    %c0_53 = arith.constant 0 : index
    %c0_54 = arith.constant 0 : index
    %119 = vector.load %arg14[%c0_53, %c0_54] : memref<1x128xf32, #tpu.memory_space<vmem>>, vector<1x128xf32>
    %120 = vector.broadcast %119 : vector<1x128xf32> to vector<8x128xf32>
    %121 = arith.mulf %118, %120 : vector<8x128xf32>
    %c0_55 = arith.constant 0 : index
    %c0_56 = arith.constant 0 : index
    %122 = vector.load %arg15[%c0_55, %c0_56] : memref<1x128xf32, #tpu.memory_space<vmem>>, vector<1x128xf32>
    %123 = vector.broadcast %122 : vector<1x128xf32> to vector<8x128xf32>
    %124 = arith.addf %121, %123 : vector<8x128xf32>
    %cst_57 = arith.constant 0.000000e+00 : f32
    %125 = vector.broadcast %cst_57 : f32 to vector<8x128xf32>
    %126 = arith.cmpf oge, %124, %125 : vector<8x128xf32>
    %127 = vector.broadcast %92 : f32 to vector<8x128xf32>
    %128 = arith.mulf %127, %124 : vector<8x128xf32>
    %129 = arith.select %126, %124, %128 : vector<8x128xi1>, vector<8x128xf32>
    %c3 = arith.constant 3 : index
    %130 = memref.load %arg22[%c3] : memref<4xf32, #tpu.memory_space<smem>>
    %131 = arith.truncf %129 : vector<8x128xf32> to vector<8x128xbf16>
    %c0_58 = arith.constant 0 : index
    %c0_59 = arith.constant 0 : index
    %132 = vector.load %arg16[%c0_58, %c0_59] : memref<128x128xbf16, #tpu.memory_space<vmem>>, vector<128x128xbf16>
    %cst_60 = arith.constant dense<0.000000e+00> : vector<8x128xf32>
    %133 = tpu.matmul %131, %132, %cst_60 {dimension_numbers = #tpu.dot_dimension_numbers<[1], [0], [0], [1], [0, 0, 1, 1], [], []>} : vector<8x128xbf16>, vector<128x128xbf16>, vector<8x128xf32> -> vector<8x128xf32>
    %c0_61 = arith.constant 0 : index
    %c0_62 = arith.constant 0 : index
    %134 = vector.load %arg17[%c0_61, %c0_62] : memref<1x128xf32, #tpu.memory_space<vmem>>, vector<1x128xf32>
    %135 = vector.broadcast %134 : vector<1x128xf32> to vector<8x128xf32>
    %136 = arith.addf %133, %135 : vector<8x128xf32>
    %cst_63 = arith.constant dense<0.000000e+00> : vector<8xf32>
    %137 = vector.multi_reduction <add>, %136, %cst_63 [1] : vector<8x128xf32> to vector<8xf32>
    %138 = vector.shape_cast %137 : vector<8xf32> to vector<8x1xf32>
    %cst_64 = arith.constant 1.280000e+02 : f32
    %139 = vector.broadcast %cst_64 : f32 to vector<8x1xf32>
    %140 = arith.divf %138, %139 : vector<8x1xf32>
    %141 = arith.mulf %136, %136 : vector<8x128xf32>
    %cst_65 = arith.constant dense<0.000000e+00> : vector<8xf32>
    %142 = vector.multi_reduction <add>, %141, %cst_65 [1] : vector<8x128xf32> to vector<8xf32>
    %143 = vector.shape_cast %142 : vector<8xf32> to vector<8x1xf32>
    %cst_66 = arith.constant 1.280000e+02 : f32
    %144 = vector.broadcast %cst_66 : f32 to vector<8x1xf32>
    %145 = arith.divf %143, %144 : vector<8x1xf32>
    %146 = arith.mulf %140, %140 : vector<8x1xf32>
    %147 = arith.subf %145, %146 : vector<8x1xf32>
    %cst_67 = arith.constant 0.000000e+00 : f32
    %148 = vector.broadcast %cst_67 : f32 to vector<8x1xf32>
    %149 = arith.maximumf %147, %148 : vector<8x1xf32>
    %150 = vector.broadcast %140 : vector<8x1xf32> to vector<8x128xf32>
    %151 = arith.subf %136, %150 : vector<8x128xf32>
    %cst_68 = arith.constant 9.99999974E-6 : f32
    %152 = vector.broadcast %cst_68 : f32 to vector<8x1xf32>
    %153 = arith.addf %149, %152 : vector<8x1xf32>
    %154 = math.rsqrt %153 : vector<8x1xf32>
    %155 = vector.broadcast %154 : vector<8x1xf32> to vector<8x128xf32>
    %156 = arith.mulf %151, %155 : vector<8x128xf32>
    %c0_69 = arith.constant 0 : index
    %c0_70 = arith.constant 0 : index
    %157 = vector.load %arg18[%c0_69, %c0_70] : memref<1x128xf32, #tpu.memory_space<vmem>>, vector<1x128xf32>
    %158 = vector.broadcast %157 : vector<1x128xf32> to vector<8x128xf32>
    %159 = arith.mulf %156, %158 : vector<8x128xf32>
    %c0_71 = arith.constant 0 : index
    %c0_72 = arith.constant 0 : index
    %160 = vector.load %arg19[%c0_71, %c0_72] : memref<1x128xf32, #tpu.memory_space<vmem>>, vector<1x128xf32>
    %161 = vector.broadcast %160 : vector<1x128xf32> to vector<8x128xf32>
    %162 = arith.addf %159, %161 : vector<8x128xf32>
    %cst_73 = arith.constant 0.000000e+00 : f32
    %163 = vector.broadcast %cst_73 : f32 to vector<8x128xf32>
    %164 = arith.cmpf oge, %162, %163 : vector<8x128xf32>
    %165 = vector.broadcast %130 : f32 to vector<8x128xf32>
    %166 = arith.mulf %165, %162 : vector<8x128xf32>
    %167 = arith.select %164, %162, %166 : vector<8x128xi1>, vector<8x128xf32>
    %168 = arith.addf %167, %129 : vector<8x128xf32>
    %169 = arith.truncf %168 : vector<8x128xf32> to vector<8x128xbf16>
    %c0_74 = arith.constant 0 : index
    %c0_75 = arith.constant 0 : index
    %170 = vector.load %arg20[%c0_74, %c0_75] : memref<128x64xbf16, #tpu.memory_space<vmem>>, vector<128x64xbf16>
    %cst_76 = arith.constant dense<0.000000e+00> : vector<8x64xf32>
    %171 = tpu.matmul %169, %170, %cst_76 {dimension_numbers = #tpu.dot_dimension_numbers<[1], [0], [0], [1], [0, 0, 1, 1], [], []>} : vector<8x128xbf16>, vector<128x64xbf16>, vector<8x64xf32> -> vector<8x64xf32>
    %c0_77 = arith.constant 0 : index
    %c0_78 = arith.constant 0 : index
    %172 = vector.load %arg21[%c0_77, %c0_78] : memref<1x64xf32, #tpu.memory_space<vmem>>, vector<1x64xf32>
    %173 = vector.broadcast %172 : vector<1x64xf32> to vector<8x64xf32>
    %174 = arith.addf %171, %173 : vector<8x64xf32>
    %c0_79 = arith.constant 0 : index
    %c0_80 = arith.constant 0 : index
    %175 = vector.load %arg24[%c0_79, %c0_80] : memref<8x64xf32, #tpu.memory_space<vmem>>, vector<8x64xf32>
    tpu.vector_store %arg24[%c0_79, %c0_80], %174 {strides = array<i32>} : memref<8x64xf32, #tpu.memory_space<vmem>>, vector<8x64xf32>,
    return
  }
  func.func @transform_0(%arg0: i32) -> (i32, i32) {
    %c0_i32 = arith.constant 0 : i32
    %c0_i32_0 = arith.constant 0 : i32
    return %arg0, %c0_i32 : i32, i32
  }
  func.func @transform_1(%arg0: i32) -> (i32, i32) {
    %c0_i32 = arith.constant 0 : i32
    %c0_i32_0 = arith.constant 0 : i32
    %c0_i32_1 = arith.constant 0 : i32
    return %c0_i32, %c0_i32_0 : i32, i32
  }
  func.func @transform_2(%arg0: i32) -> (i32, i32) {
    %c0_i32 = arith.constant 0 : i32
    %c0_i32_0 = arith.constant 0 : i32
    %c0_i32_1 = arith.constant 0 : i32
    return %c0_i32, %c0_i32_0 : i32, i32
  }
  func.func @transform_3(%arg0: i32) -> (i32, i32) {
    %c0_i32 = arith.constant 0 : i32
    %c0_i32_0 = arith.constant 0 : i32
    %c0_i32_1 = arith.constant 0 : i32
    return %c0_i32, %c0_i32_0 : i32, i32
  }
  func.func @transform_4(%arg0: i32) -> (i32, i32) {
    %c0_i32 = arith.constant 0 : i32
    %c0_i32_0 = arith.constant 0 : i32
    %c0_i32_1 = arith.constant 0 : i32
    return %c0_i32, %c0_i32_0 : i32, i32
  }
  func.func @transform_5(%arg0: i32) -> (i32, i32) {
    %c0_i32 = arith.constant 0 : i32
    %c0_i32_0 = arith.constant 0 : i32
    %c0_i32_1 = arith.constant 0 : i32
    return %c0_i32, %c0_i32_0 : i32, i32
  }
  func.func @transform_6(%arg0: i32) -> (i32, i32) {
    %c0_i32 = arith.constant 0 : i32
    %c0_i32_0 = arith.constant 0 : i32
    %c0_i32_1 = arith.constant 0 : i32
    return %c0_i32, %c0_i32_0 : i32, i32
  }
  func.func @transform_7(%arg0: i32) -> (i32, i32) {
    %c0_i32 = arith.constant 0 : i32
    %c0_i32_0 = arith.constant 0 : i32
    %c0_i32_1 = arith.constant 0 : i32
    return %c0_i32, %c0_i32_0 : i32, i32
  }
  func.func @transform_8(%arg0: i32) -> (i32, i32) {
    %c0_i32 = arith.constant 0 : i32
    %c0_i32_0 = arith.constant 0 : i32
    %c0_i32_1 = arith.constant 0 : i32
    return %c0_i32, %c0_i32_0 : i32, i32
  }
  func.func @transform_9(%arg0: i32) -> (i32, i32) {
    %c0_i32 = arith.constant 0 : i32
    %c0_i32_0 = arith.constant 0 : i32
    %c0_i32_1 = arith.constant 0 : i32
    return %c0_i32, %c0_i32_0 : i32, i32
  }
  func.func @transform_10(%arg0: i32) -> (i32, i32) {
    %c0_i32 = arith.constant 0 : i32
    %c0_i32_0 = arith.constant 0 : i32
    %c0_i32_1 = arith.constant 0 : i32
    return %c0_i32, %c0_i32_0 : i32, i32
  }
  func.func @transform_11(%arg0: i32) -> (i32, i32) {
    %c0_i32 = arith.constant 0 : i32
    %c0_i32_0 = arith.constant 0 : i32
    %c0_i32_1 = arith.constant 0 : i32
    return %c0_i32, %c0_i32_0 : i32, i32
  }
  func.func @transform_12(%arg0: i32) -> (i32, i32) {
    %c0_i32 = arith.constant 0 : i32
    %c0_i32_0 = arith.constant 0 : i32
    %c0_i32_1 = arith.constant 0 : i32
    return %c0_i32, %c0_i32_0 : i32, i32
  }
  func.func @transform_13(%arg0: i32) -> (i32, i32) {
    %c0_i32 = arith.constant 0 : i32
    %c0_i32_0 = arith.constant 0 : i32
    %c0_i32_1 = arith.constant 0 : i32
    return %c0_i32, %c0_i32_0 : i32, i32
  }
  func.func @transform_14(%arg0: i32) -> (i32, i32) {
    %c0_i32 = arith.constant 0 : i32
    %c0_i32_0 = arith.constant 0 : i32
    %c0_i32_1 = arith.constant 0 : i32
    return %c0_i32, %c0_i32_0 : i32, i32
  }
  func.func @transform_15(%arg0: i32) -> (i32, i32) {
    %c0_i32 = arith.constant 0 : i32
    %c0_i32_0 = arith.constant 0 : i32
    %c0_i32_1 = arith.constant 0 : i32
    return %c0_i32, %c0_i32_0 : i32, i32
  }
  func.func @transform_16(%arg0: i32) -> (i32, i32) {
    %c0_i32 = arith.constant 0 : i32
    %c0_i32_0 = arith.constant 0 : i32
    %c0_i32_1 = arith.constant 0 : i32
    return %c0_i32, %c0_i32_0 : i32, i32
  }
  func.func @transform_17(%arg0: i32) -> (i32, i32) {
    %c0_i32 = arith.constant 0 : i32
    %c0_i32_0 = arith.constant 0 : i32
    %c0_i32_1 = arith.constant 0 : i32
    return %c0_i32, %c0_i32_0 : i32, i32
  }
  func.func @transform_18(%arg0: i32) -> (i32, i32) {
    %c0_i32 = arith.constant 0 : i32
    %c0_i32_0 = arith.constant 0 : i32
    %c0_i32_1 = arith.constant 0 : i32
    return %c0_i32, %c0_i32_0 : i32, i32
  }
  func.func @transform_19(%arg0: i32) -> (i32, i32) {
    %c0_i32 = arith.constant 0 : i32
    %c0_i32_0 = arith.constant 0 : i32
    %c0_i32_1 = arith.constant 0 : i32
    return %c0_i32, %c0_i32_0 : i32, i32
  }
  func.func @transform_20(%arg0: i32) -> (i32, i32) {
    %c0_i32 = arith.constant 0 : i32
    %c0_i32_0 = arith.constant 0 : i32
    %c0_i32_1 = arith.constant 0 : i32
    return %c0_i32, %c0_i32_0 : i32, i32
  }
  func.func @transform_21(%arg0: i32) -> i32 {
    %c0_i32 = arith.constant 0 : i32
    %c0_i32_0 = arith.constant 0 : i32
    return %c0_i32 : i32
  }
  func.func @transform_22(%arg0: i32) -> (i32, i32) {
    %c0_i32 = arith.constant 0 : i32
    %c0_i32_0 = arith.constant 0 : i32
    return %arg0, %c0_i32 : i32, i32
  }
  func.func @transform_23(%arg0: i32) -> (i32, i32) {
    %c0_i32 = arith.constant 0 : i32
    %c0_i32_0 = arith.constant 0 : i32
    return %arg0, %c0_i32 : i32, i32
  }
}

</mosaic_0001>

<bundles_post_ra>
// kernel: autoencoder_forward.1
= control target key start
LH: loop header
LB: loop body
LE: loop exit
PB: predicated region body
PF: predicated region fallthrough
CT: control target
= control target key end

     0   :  { %s1881_s0 = inlined_call_operand.vmem [shape: bf16[8,64], index: 0, kind: input, shape index: {}]   ;;  %s1882_s1 = inlined_call_operand.vmem [shape: bf16[64,128], index: 1, kind: input, shape index: {}]   ;;  %s1883_s2 = inlined_call_operand.vmem [shape: f32[1,128], index: 2, kind: input, shape index: {}]   ;;  %s1884_s3 = inlined_call_operand.vmem [shape: f32[1,128], index: 3, kind: input, shape index: {}]   ;;  %s1885_s4 = inlined_call_operand.vmem [shape: f32[1,128], index: 4, kind: input, shape index: {}]   ;;  %s1886_s5 = inlined_call_operand.vmem [shape: bf16[128,128], index: 5, kind: input, shape index: {}]   ;;  %s1887_s6 = inlined_call_operand.vmem [shape: f32[1,128], index: 6, kind: input, shape index: {}]   ;;  %s1888_s7 = inlined_call_operand.vmem [shape: f32[1,128], index: 7, kind: input, shape index: {}]   ;;  %s1889_s8 = inlined_call_operand.vmem [shape: f32[1,128], index: 8, kind: input, shape index: {}]   ;;  %s1890_s9 = inlined_call_operand.vmem [shape: bf16[128,32], index: 9, kind: input, shape index: {}]   ;;  %s1891_s10 = inlined_call_operand.vmem [shape: f32[1,32], index: 10, kind: input, shape index: {}]   ;;  %s1892_s11 = inlined_call_operand.vmem [shape: bf16[32,128], index: 11, kind: input, shape index: {}]   ;;  %s1893_s12 = inlined_call_operand.hbm [shape: f32[1,128], index: 12, kind: input, shape index: {}]   ;;  %s1894_s13 = inlined_call_operand.hbm [shape: f32[1,128], index: 13, kind: input, shape index: {}]   ;;  %s1895_s14 = inlined_call_operand.hbm [shape: f32[1,128], index: 14, kind: input, shape index: {}]   ;;  %s1896_s15 = inlined_call_operand.vmem [shape: bf16[128,128], index: 15, kind: input, shape index: {}]   ;;  %s1897_s16 = inlined_call_operand.hbm [shape: f32[1,128], index: 16, kind: input, shape index: {}]   ;;  %s1898_s17 = inlined_call_operand.hbm [shape: f32[1,128], index: 17, kind: input, shape index: {}]   ;;  %s1899_s18 = inlined_call_operand.hbm [shape: f32[1,128], index: 18, kind: input, shape index: {}]   ;;  %s1900_s19 = inlined_call_operand.vmem [shape: bf16[128,64], index: 19, kind: input, shape index: {}]   ;;  %s1901_s20 = inlined_call_operand.hbm [shape: f32[1,64], index: 20, kind: input, shape index: {}]   ;;  %s1902_s21 = inlined_call_operand.hbm [shape: f32[4], index: 21, kind: input, shape index: {}]   ;;  %s1903_s22 = inlined_call_operand.hbm [shape: f32[8,32], index: 22, kind: output, shape index: {0}]   ;;  %s1904_s23 = inlined_call_operand.hbm [shape: f32[8,64], index: 23, kind: output, shape index: {1}]  }
   0x1   :  { %1907 = sst [smem:[#allocation26_spill]] %s1881_s0 }
   0x2   :  { %1908 = sst [smem:[#allocation27_spill]] %s1882_s1 }
   0x3   :  { %1909 = sst [smem:[#allocation28_spill]] %s1883_s2 }
   0x4   :  { %1910 = sst [smem:[#allocation29_spill]] %s1884_s3 }
   0x5   :  { %1911 = sst [smem:[#allocation30_spill]] %s1885_s4 }
   0x6   :  { %1912 = sst [smem:[#allocation31_spill]] %s1886_s5 }
   0x7   :  { %1913 = sst [smem:[#allocation32_spill]] %s1887_s6 }
   0x8   :  { %1914 = sst [smem:[#allocation33_spill]] %s1888_s7 }
   0x9   :  { %29 = vsyncpa [#allocation3], 0 }
   0xa   :  { %30 = vsyncpa [#allocation7], 0 }
   0xb   :  { %31 = vsyncpa [#allocation10], 0 }
   0xc   :  { %32 = vsyncpa [#allocation13], 0 }
   0xd   :  { %33 = vsyncpa [#allocation5], 0 }
   0xe   :  { %34 = vsyncpa [#allocation4], 0 }
   0xf   :  { %35 = vsyncpa [#allocation18], 0  ;;  %s1436_s4 = smov [#allocation6]   ;;  %s1437_s24 = smov [#allocation9]  }
  0x10   :  { %s76_s30 = sshll.u32 %s1436_s4, 4  ;;  %s98_s25 = sshll.u32 %s1437_s24, 4  ;;  %s77_s30 = int_to_ptr.vmem [resolvable:$true] %s76_s30  ;;  %s99_s25 = int_to_ptr.vmem [resolvable:$true] %s98_s25 }
  0x11   :  { %s1214_s26 = scalar_lea.hbm %s1894_s13, 16 }
  0x12   :  { %p1215_p0 = scmp.ne.s32.totalorder %s1894_s13, %s1214_s26  ;;  %p1218_p1 = scmp.lt.u32.totalorder %s1214_s26, %s1894_s13 }
  0x14   :  { %p1220_p2 = pnand %p1218_p1, %p1215_p0 }
  0x16   :  { %1223 = shalt.err (!%p1220_p2)
}
  0x17   :  { %s1224_s28 = scalar_lea.vmem %s77_s30, 16  ;;  %s1228_s29 = scalar_lea.vmem %s77_s30, 32 }
  0x18   :  { %p1225_p3 = scmp.ne.s32.totalorder %s77_s30, %s1224_s28  ;;  %p1229_p4 = scmp.lt.s32.totalorder %s77_s30, %s77_s30 }
  0x19   :  { %p1230_p5 = scmp.lt.s32.totalorder %s1228_s29, %s1224_s28 }
  0x1b   :  { %p1231_p6 = por %p1230_p5, %p1229_p4 }
  0x1d   :  { %p1232_p7 = pnand %p1231_p6, %p1225_p3 }
  0x1f   :  { %1235 = shalt.err (!%p1232_p7)
}
  0x20   :  { %79 = dma.hbm_to_vmem [thread:$0]  %s1894_s13, 16, %s77_s30, [#allocation7]  }
  0x21   :  { %s1236_s5 = scalar_lea.hbm %s1897_s16, 16 }
  0x22   :  { %p1237_p8 = scmp.ne.s32.totalorder %s1897_s16, %s1236_s5  ;;  %p1240_p9 = scmp.lt.u32.totalorder %s1236_s5, %s1897_s16 }
  0x24   :  { %p1242_p10 = pnand %p1240_p9, %p1237_p8 }
  0x26   :  { %1245 = shalt.err (!%p1242_p10)
}
  0x27   :  { %s1246_s27 = scalar_lea.vmem %s99_s25, 16  ;;  %s1250_s7 = scalar_lea.vmem %s99_s25, 32 }
  0x28   :  { %p1247_p11 = scmp.ne.s32.totalorder %s99_s25, %s1246_s27  ;;  %p1251_p12 = scmp.lt.s32.totalorder %s99_s25, %s99_s25 }
  0x29   :  { %p1252_p13 = scmp.lt.s32.totalorder %s1250_s7, %s1246_s27 }
  0x2b   :  { %p1253_p0 = por %p1252_p13, %p1251_p12 }
  0x2d   :  { %p1254_p1 = pnand %p1253_p0, %p1247_p11 }
  0x2f   :  { %1257 = shalt.err (!%p1254_p1)
}
  0x30   :  { %101 = dma.hbm_to_vmem [thread:$0]  %s1897_s16, 16, %s99_s25, [#allocation10]  }
  0x31   :  { %s1438_s28 = smov [#allocation12]   ;;  %s1439_s3 = smov [#allocation2]  }
  0x32   :  { %s118_s29 = sshll.u32 %s1438_s28, 4  ;;  %s66_s0 = sshll.u32 %s1439_s3, 4  ;;  %s119_s29 = int_to_ptr.vmem [resolvable:$true] %s118_s29  ;;  %s67_s0 = int_to_ptr.vmem [resolvable:$true] %s66_s0 }
  0x33   :  { %s1258_s5 = scalar_lea.hbm %s1899_s18, 16 }
  0x34   :  { %p1259_p2 = scmp.ne.s32.totalorder %s1899_s18, %s1258_s5  ;;  %p1262_p3 = scmp.lt.u32.totalorder %s1258_s5, %s1899_s18 }
  0x36   :  { %p1264_p4 = pnand %p1262_p3, %p1259_p2 }
  0x38   :  { %1267 = shalt.err (!%p1264_p4)
}
  0x39   :  { %s1268_s16 = scalar_lea.vmem %s119_s29, 16  ;;  %s1272_s25 = scalar_lea.vmem %s119_s29, 32 }
  0x3a   :  { %p1269_p5 = scmp.ne.s32.totalorder %s119_s29, %s1268_s16  ;;  %p1273_p6 = scmp.lt.s32.totalorder %s119_s29, %s119_s29 }
  0x3b   :  { %p1274_p7 = scmp.lt.s32.totalorder %s1272_s25, %s1268_s16 }
  0x3d   :  { %p1275_p8 = por %p1274_p7, %p1273_p6 }
  0x3f   :  { %p1276_p9 = pnand %p1275_p8, %p1269_p5 }
  0x41   :  { %1279 = shalt.err (!%p1276_p9)
}
  0x42   :  { %121 = dma.hbm_to_vmem [thread:$0]  %s1899_s18, 16, %s119_s29, [#allocation13]  }
  0x43   :  { %s1280_s28 = scalar_lea.hbm %s1893_s12, 16 }
  0x44   :  { %p1281_p10 = scmp.ne.s32.totalorder %s1893_s12, %s1280_s28  ;;  %p1284_p11 = scmp.lt.u32.totalorder %s1280_s28, %s1893_s12 }
  0x46   :  { %p1286_p12 = pnand %p1284_p11, %p1281_p10 }
  0x48   :  { %1289 = shalt.err (!%p1286_p12)
}
  0x49   :  { %s1290_s1 = scalar_lea.vmem %s67_s0, 16  ;;  %s1294_s26 = scalar_lea.vmem %s67_s0, 32 }
  0x4a   :  { %p1291_p13 = scmp.ne.s32.totalorder %s67_s0, %s1290_s1  ;;  %p1295_p0 = scmp.lt.s32.totalorder %s67_s0, %s67_s0 }
  0x4b   :  { %p1296_p1 = scmp.lt.s32.totalorder %s1294_s26, %s1290_s1 }
  0x4d   :  { %p1297_p2 = por %p1296_p1, %p1295_p0 }
  0x4f   :  { %p1298_p3 = pnand %p1297_p2, %p1291_p13 }
  0x51   :  { %1301 = shalt.err (!%p1298_p3)
}
  0x52   :  { %69 = dma.hbm_to_vmem [thread:$0]  %s1893_s12, 16, %s67_s0, [#allocation3]  }
  0x53   :  { %s1440_s2 = smov [#allocation8]   ;;  %s1441_s16 = smov [#allocation11]  }
  0x54   :  { %s86_s6 = sshll.u32 %s1440_s2, 4  ;;  %s108_s25 = sshll.u32 %s1441_s16, 4  ;;  %s87_s6 = int_to_ptr.vmem [resolvable:$true] %s86_s6  ;;  %s109_s25 = int_to_ptr.vmem [resolvable:$true] %s108_s25 }
  0x55   :  { %s1302_s13 = scalar_lea.hbm %s1895_s14, 16 }
  0x56   :  { %p1303_p4 = scmp.ne.s32.totalorder %s1895_s14, %s1302_s13  ;;  %p1306_p5 = scmp.lt.u32.totalorder %s1302_s13, %s1895_s14 }
  0x58   :  { %p1308_p6 = pnand %p1306_p5, %p1303_p4 }
  0x5a   :  { %1311 = shalt.err (!%p1308_p6)
}
  0x5b   :  { %s1312_s12 = scalar_lea.vmem %s87_s6, 16  ;;  %s1316_s0 = scalar_lea.vmem %s87_s6, 32 }
  0x5c   :  { %p1313_p7 = scmp.ne.s32.totalorder %s87_s6, %s1312_s12  ;;  %p1317_p8 = scmp.lt.s32.totalorder %s87_s6, %s87_s6 }
  0x5d   :  { %p1318_p9 = scmp.lt.s32.totalorder %s1316_s0, %s1312_s12 }
  0x5f   :  { %p1319_p10 = por %p1318_p9, %p1317_p8 }
  0x61   :  { %p1320_p11 = pnand %p1319_p10, %p1313_p7 }
  0x63   :  { %1323 = shalt.err (!%p1320_p11)
}
  0x64   :  { %89 = dma.hbm_to_vmem [thread:$0]  %s1895_s14, 16, %s87_s6, [#allocation7]  }
  0x65   :  { %s1324_s18 = scalar_lea.hbm %s1898_s17, 16 }
  0x66   :  { %p1325_p12 = scmp.ne.s32.totalorder %s1898_s17, %s1324_s18  ;;  %p1328_p13 = scmp.lt.u32.totalorder %s1324_s18, %s1898_s17 }
  0x68   :  { %p1330_p0 = pnand %p1328_p13, %p1325_p12 }
  0x6a   :  { %1333 = shalt.err (!%p1330_p0)
}
  0x6b   :  { %s1334_s7 = scalar_lea.vmem %s109_s25, 16  ;;  %s1338_s13 = scalar_lea.vmem %s109_s25, 32 }
  0x6c   :  { %p1335_p1 = scmp.ne.s32.totalorder %s109_s25, %s1334_s7  ;;  %p1339_p2 = scmp.lt.s32.totalorder %s109_s25, %s109_s25 }
  0x6d   :  { %p1340_p3 = scmp.lt.s32.totalorder %s1338_s13, %s1334_s7 }
  0x6f   :  { %p1341_p4 = por %p1340_p3, %p1339_p2 }
  0x71   :  { %p1342_p5 = pnand %p1341_p4, %p1335_p1 }
  0x73   :  { %1345 = shalt.err (!%p1342_p5)
}
  0x74   :  { %111 = dma.hbm_to_vmem [thread:$0]  %s1898_s17, 16, %s109_s25, [#allocation10]  }
  0x75   :  { %s1442_s30 = smov [#allocation14]   ;;  %s1346_s12 = scalar_lea.hbm %s1901_s20, 16 }
  0x76   :  { %s130_s28 = sshll.u32 %s1442_s30, 4  ;;  %p1347_p6 = scmp.ne.s32.totalorder %s1901_s20, %s1346_s12  ;;  %s131_s28 = int_to_ptr.vmem [resolvable:$true] %s130_s28 }
  0x77   :  { %p1350_p7 = scmp.lt.u32.totalorder %s1346_s12, %s1901_s20 }
  0x79   :  { %p1352_p8 = pnand %p1350_p7, %p1347_p6 }
  0x7b   :  { %1355 = shalt.err (!%p1352_p8)
}
  0x7c   :  { %s1356_s26 = scalar_lea.vmem %s131_s28, 16  ;;  %s1360_s17 = scalar_lea.vmem %s131_s28, 32 }
  0x7d   :  { %p1357_p9 = scmp.ne.s32.totalorder %s131_s28, %s1356_s26  ;;  %p1361_p10 = scmp.lt.s32.totalorder %s131_s28, %s131_s28 }
  0x7e   :  { %p1362_p11 = scmp.lt.s32.totalorder %s1360_s17, %s1356_s26 }
  0x80   :  { %p1363_p12 = por %p1362_p11, %p1361_p10 }
  0x82   :  { %p1364_p13 = pnand %p1363_p12, %p1357_p9 }
  0x84   :  { %1367 = shalt.err (!%p1364_p13)
}
  0x85   :  { %133 = dma.hbm_to_vmem [thread:$0]  %s1901_s20, 16, %s131_s28, [#allocation13]  }
  0x86   :  { %s1368_s16 = scalar_lea.hbm %s1902_s21, 16 }
  0x87   :  { %p1369_p0 = scmp.ne.s32.totalorder %s1902_s21, %s1368_s16  ;;  %p1372_p1 = scmp.lt.u32.totalorder %s1368_s16, %s1902_s21 }
  0x89   :  { %p1374_p2 = pnand %p1372_p1, %p1369_p0 }
  0x8b   :  { %1377 = shalt.err (!%p1374_p2)
}
  0x8c   :  { %s1443_s6 = smov [#allocation15]  }
  0x8d   :  { %141 = dma.hbm_to_smem %s1902_s21, 16, %s1443_s6, [#allocation5]  }
  0x8e   :  { %1422 = dma.done.wait [#allocation3], 16  }
  0x8f   :  { %1423 = vsyncadd [#allocation3], 4294967280 }
  0x90   :  { %1424 = dma.done.wait [#allocation7], 32  }
  0x91   :  { %1425 = vsyncadd [#allocation7], 4294967264 }
  0x92   :  { %1426 = dma.done.wait [#allocation10], 32  }
  0x93   :  { %1427 = vsyncadd [#allocation10], 4294967264 }
  0x94   :  { %1428 = dma.done.wait [#allocation13], 32  }
  0x95   :  { %1429 = vsyncadd [#allocation13], 4294967264 }
  0x96   :  { %1430 = dma.done.wait [#allocation5], 16  }
  0x97   :  { %1431 = vsyncadd [#allocation5], 4294967280 }
  0x98   :  { %166 = sfence }
  0x99   :  { %s1915_s4 = sld [smem:[#allocation27_spill]]  ;;  %v1444_v1 = vmov 0.0   ;;  %vm1445_vm0 = vmmov 0   ;;  %vm209_vm1 = vcmask 523264   ;;  %s1916_s25 = sld [smem:[#allocation26_spill]]  ;;  %v1178_v47 = vld [vmem:[%s1890_s9] sm:$0xff]  }
  0x9a   :  { %1054 = vmatprep.subr.bf16.mxu0 %v1444_v1  ;;  %1066 = vmatprep.subr.bf16.mxu1 %v1444_v1  ;;  %s1917_s2 = sld [smem:[#allocation28_spill]]  ;;  %s1918_s7 = sld [smem:[#allocation31_spill]]  ;;  %v1179_v48 = vld [vmem:[%s1890_s9 + $0x8] sm:$0xff]   ;;  %v1180_v49 = vld [vmem:[%s1890_s9 + $0x10] sm:$0xff]   ;;  %v1181_v50 = vld [vmem:[%s1890_s9 + $0x18] sm:$0xff]   ;;  %vm549_vm4 = vcmask 261120  }
  0x9b   :  { %1062 = vmatprep.mubr.msk.bf16.mxu0 %vm1445_vm0, %v1444_v1  ;;  %1082 = vmatprep.mubr.msk.bf16.mxu1 %vm1445_vm0, %v1444_v1  ;;  %s169_s26 = sld [smem:[#allocation15]]  ;;  %s1919_s18 = sld [smem:[#allocation29_spill]]  ;;  %v1182_v51 = vld [vmem:[%s1890_s9 + $0x20] sm:$0xff]   ;;  %v1183_v52 = vld [vmem:[%s1890_s9 + $0x28] sm:$0xff]   ;;  %v1184_v53 = vld [vmem:[%s1890_s9 + $0x30] sm:$0xff]  }
  0x9c   :  { %s1920_s16 = sld [smem:[#allocation30_spill]]  ;;  %s1921_s13 = sld [smem:[#allocation32_spill]]  ;;  %v1185_v54 = vld [vmem:[%s1890_s9 + $0x38] sm:$0xff]  }
  0x9d   :  { %s1922_s9 = sld [smem:[#allocation33_spill]]  ;;  %s982_s29 = sld [smem:[#allocation15 + $0x2]] }
  0x9f   :  { %v1166_v0 = vld [vmem:[%s1915_s4] sm:$0xff]   ;;  %v1167_v2 = vld [vmem:[%s1915_s4 + $0x8] sm:$0xff]   ;;  %v1168_v3 = vld [vmem:[%s1915_s4 + $0x10] sm:$0xff]  }
  0xa0   :  { %1055 = vmatpush3.bf16.msra.mxu0 %v1166_v0  ;;  %v1169_v4 = vld [vmem:[%s1915_s4 + $0x18] sm:$0xff]   ;;  %v168_v5 = vld [vmem:[%s1916_s25] sm:$0xf]  ;;  %v1171_v14 = vld [vmem:[%s1918_s7 + $0x8] sm:$0xff]   ;;  %s989_s4 = sld [smem:[#allocation15 + $0x3]] }
  0xa1   :  { %1056 = vmatprep.subr.bf16.mxu0 %v1444_v1  ;;  %v953_v6 = vld [vmem:[%s1917_s2] ss:$0 sm:$0xff]  ;;  %v1172_v15 = vld [vmem:[%s1918_s7 + $0x10] sm:$0xff]   ;;  %v1173_v16 = vld [vmem:[%s1918_s7 + $0x18] sm:$0xff]   ;;  %v285_v35 = vstv %s169_s26 }
  0xa2   :  { %v1170_v13 = vld [vmem:[%s1918_s7] sm:$0xff]   ;;  %v1175_v18 = vld [vmem:[%s1918_s7 + $0x28] sm:$0xff]   ;;  %v1176_v19 = vld [vmem:[%s1918_s7 + $0x30] sm:$0xff]  }
  0xa3   :  { %1067 = vmatpush3.bf16.msra.mxu1 %v1170_v13  ;;  %v1174_v17 = vld [vmem:[%s1918_s7 + $0x20] sm:$0xff]   ;;  %v1177_v20 = vld [vmem:[%s1918_s7 + $0x38] sm:$0xff]  }
  0xa4   :  { %1057 = vmatpush3.bf16.msra.mxu0 %v1167_v2  ;;  %1068 = vmatprep.subr.bf16.mxu1 %v1444_v1  ;;  %v959_v31 = vld [vmem:[%s1919_s18] ss:$0 sm:$0xff]  ;;  %s961_s18 = sld [smem:[#allocation15 + $0x1]] }
  0xa5   :  { %1058 = vmatprep.subr.bf16.mxu0 %v1444_v1  ;;  %v960_v33 = vld [vmem:[%s1920_s16] ss:$0 sm:$0xff] }
  0xa6   :  { %v962_v40 = vld [vmem:[%s1921_s13] ss:$0 sm:$0xff] }
  0xa7   :  { %1069 = vmatpush3.bf16.msra.mxu1 %v1171_v14  ;;  %v971_v2 = vld [vmem:[%s1922_s9] ss:$0 sm:$0xff] }
  0xa8   :  { %1059 = vmatpush3.bf16.msra.mxu0 %v1168_v3  ;;  %1070 = vmatprep.subr.bf16.mxu1 %v1444_v1 }
  0xa9   :  { %1060 = vmatprep.subr.bf16.mxu0 %v1444_v1 }
  0xab   :  { %1071 = vmatpush3.bf16.msra.mxu1 %v1172_v15 }
  0xac   :  { %1061 = vmatpush3.bf16.msra.mxu0 %v1169_v4  ;;  %1072 = vmatprep.subr.bf16.mxu1 %v1444_v1  ;;  %v972_v4 = vld [vmem:[%s1889_s8] ss:$0 sm:$0xff] }
  0xad   :  { %1086 = vmatprep.subr.bf16.mxu0 %v1444_v1 }
  0xaf   :  { %1063 = vmatmul.mubr.msk.bf16.vlgmr.msra.gmra.mrb[0].mxu0 %vm209_vm1, %v168_v5  ;;  %1073 = vmatpush3.bf16.msra.mxu1 %v1173_v16 }
  0xb0   :  { %1102 = vmatprep.mubr.msk.bf16.mxu0 %vm1445_vm0, %v1444_v1  ;;  %1074 = vmatprep.subr.bf16.mxu1 %v1444_v1 }
  0xb1   :  { %1087 = vmatpush3.bf16.msra.mxu0 %v1178_v47 }
  0xb2   :  { %1088 = vmatprep.subr.bf16.mxu0 %v1444_v1 }
  0xb3   :  { %1075 = vmatpush3.bf16.msra.mxu1 %v1174_v17 }
  0xb4   :  { %1076 = vmatprep.subr.bf16.mxu1 %v1444_v1 }
  0xb5   :  { %1089 = vmatpush3.bf16.msra.mxu0 %v1179_v48 }
  0xb6   :  { %1090 = vmatprep.subr.bf16.mxu0 %v1444_v1 }
  0xb7   :  { %1077 = vmatpush3.bf16.msra.mxu1 %v1175_v18 }
  0xb8   :  { %1078 = vmatprep.subr.bf16.mxu1 %v1444_v1 }
  0xb9   :  { %1091 = vmatpush3.bf16.msra.mxu0 %v1180_v49 }
  0xba   :  { %1092 = vmatprep.subr.bf16.mxu0 %v1444_v1 }
  0xbb   :  { %1079 = vmatpush3.bf16.msra.mxu1 %v1176_v19 }
  0xbc   :  { %1080 = vmatprep.subr.bf16.mxu1 %v1444_v1 }
  0xbd   :  { %1093 = vmatpush3.bf16.msra.mxu0 %v1181_v50 }
  0xbe   :  { %1094 = vmatprep.subr.bf16.mxu0 %v1444_v1 }
  0xbf   :  { %1081 = vmatpush3.bf16.msra.mxu1 %v1177_v20  ;;  %v1186_v20 = vld [vmem:[%s1892_s11] sm:$0xff]  }
  0xc0   :  { %1106 = vmatprep.subr.bf16.mxu1 %v1444_v1 }
  0xc1   :  { %1095 = vmatpush3.bf16.msra.mxu0 %v1182_v51 }
  0xc2   :  { %1096 = vmatprep.subr.bf16.mxu0 %v1444_v1 }
  0xc5   :  { %1097 = vmatpush3.bf16.msra.mxu0 %v1183_v52  ;;  %v987_v52 = vld [vmem:[#allocation6] ss:$0 sm:$0xff] }
  0xc6   :  { %1098 = vmatprep.subr.bf16.mxu0 %v1444_v1 }
  0xc9   :  { %1099 = vmatpush3.bf16.msra.mxu0 %v1184_v53 }
  0xca   :  { %1100 = vmatprep.subr.bf16.mxu0 %v1444_v1 }
  0xcd   :  { %1101 = vmatpush3.bf16.msra.mxu0 %v1185_v54  ;;  %v988_v54 = vld [vmem:[#allocation8] ss:$0 sm:$0xff] }
  0xce   :  { %1134 = vmatprep.subr.bf16.mxu0 %v1444_v1 }
 0x182   :  { %v247_v7 = vpop.f32.mrb[0].mxu0 }
 0x183   :  { %v248_v8 = vadd.f32 %v953_v6, %v247_v7  ;;  %v1064_v9 = vpop.f32.mrb[1].mxu0  ;;  %v432_v6 = vstv %s961_s18 }
 0x184   :  { %v250_v10 = vpop.f32.mrb[2].mxu0 }
 0x185   :  { %253 = vadd.xlane.f32.xlu0 %v248_v8  ;;  %v1065_v11 = vpop.f32.mrb[3].mxu0  ;;  %v257_v12 = vmul.f32 %v248_v8, %v248_v8 }
 0x189   :  { %258 = vadd.xlane.f32.xlu0 %v257_v12  ;;  %v973_v12 = vld [vmem:[%s1891_s10] ss:$0 sm:$0xff] }
 0x212   :  { %v254_v21 = vpop.xlane.xlu0 %253 }
 0x213   :  { %v256_v22 = vmul.f32 0.0078125, %v254_v21  ;;  %v1187_v21 = vld [vmem:[%s1892_s11 + $0x8] sm:$0xff]  }
 0x215   :  { %v261_v24 = vmul.f32 %v256_v22, %v256_v22  ;;  %v264_v29 = vsub.f32 %v248_v8, %v256_v22 }
 0x216   :  { %v259_v23 = vpop.xlane.xlu0 %258 }
 0x217   :  { %v260_v25 = vmul.f32 0.0078125, %v259_v23 }
 0x219   :  { %v262_v26 = vsub.f32 %v260_v25, %v261_v24 }
 0x21b   :  { %v263_v27 = vmax.f32 %v262_v26, 0.0 }
 0x21d   :  { %v265_v28 = vadd.f32 1e-05, %v263_v27  ;;  %v983_v27 = vld [vmem:[#allocation2] ss:$0 sm:$0xff] }
 0x21f   :  { %1204 = vrsqrt.f32 %v265_v28 }
 0x229   :  { %v1205_v30 = vpop.eup %1204 }
 0x22a   :  { %v267_v32 = vmul.f32 %v1205_v30, %v264_v29 }
 0x22c   :  { %v275_v34 = vmul.f32 %v959_v31, %v267_v32 }
 0x22e   :  { %v283_v36 = vadd.f32 %v960_v33, %v275_v34  ;;  %v1188_v34 = vld [vmem:[%s1896_s15] sm:$0xff]  }
 0x230   :  { %vm284_vm2 = vcmp.ge.f32.partialorder %v283_v36, 0.0  ;;  %v286_v37 = vmul.f32 %v285_v35, %v283_v36  ;;  %v1189_v35 = vld [vmem:[%s1896_s15 + $0x8] sm:$0xff]  }
 0x232   :  { %v287_v38 = vsel %vm284_vm2, %v283_v36, %v286_v37  ;;  %v1190_v36 = vld [vmem:[%s1896_s15 + $0x10] sm:$0xff]   ;;  %v1191_v37 = vld [vmem:[%s1896_s15 + $0x18] sm:$0xff]  }
 0x233   :  { %v289_v39 = vpack.c.bf16 %v287_v38, %v287_v38 }
 0x235   :  { %1083 = vmatmul.mubr.bf16.vlgmr.msra.gmra.mrb[0].mxu1 %v289_v39  ;;  %v1193_v39 = vld [vmem:[%s1896_s15 + $0x28] sm:$0xff]  }
 0x236   :  { %1110 = vmatprep.mubr.msk.bf16.mxu1 %vm1445_vm0, %v1444_v1  ;;  %1107 = vmatpush3.bf16.msra.mxu1 %v1186_v20 }
 0x237   :  { %1108 = vmatprep.subr.bf16.mxu1 %v1444_v1 }
 0x23a   :  { %1109 = vmatpush3.bf16.msra.mxu1 %v1187_v21 }
 0x23b   :  { %1114 = vmatprep.subr.bf16.mxu1 %v1444_v1 }
 0x308   :  { %v395_v41 = vpop.f32.mrb[0].mxu1 }
 0x309   :  { %v396_v42 = vadd.f32 %v962_v40, %v395_v41  ;;  %v1084_v43 = vpop.f32.mrb[1].mxu1  ;;  %v1194_v40 = vld [vmem:[%s1896_s15 + $0x30] sm:$0xff]   ;;  %v1195_v41 = vld [vmem:[%s1896_s15 + $0x38] sm:$0xff]  }
 0x30a   :  { %v398_v44 = vpop.f32.mrb[2].mxu1 }
 0x30b   :  { %401 = vadd.xlane.f32.xlu1 %v396_v42  ;;  %v1085_v45 = vpop.f32.mrb[3].mxu1  ;;  %v404_v46 = vmul.f32 %v396_v42, %v396_v42 }
 0x30f   :  { %405 = vadd.xlane.f32.xlu1 %v404_v46 }
 0x398   :  { %v402_v55 = vpop.xlane.xlu1 %401 }
 0x399   :  { %v403_v56 = vmul.f32 0.0078125, %v402_v55 }
 0x39b   :  { %v408_v58 = vmul.f32 %v403_v56, %v403_v56  ;;  %v411_v63 = vsub.f32 %v396_v42, %v403_v56  ;;  %v656_v56 = vstv %s982_s29 }
 0x39c   :  { %v406_v57 = vpop.xlane.xlu1 %405 }
 0x39d   :  { %v407_v59 = vmul.f32 0.0078125, %v406_v57 }
 0x39f   :  { %v409_v60 = vsub.f32 %v407_v59, %v408_v58 }
 0x3a1   :  { %v410_v61 = vmax.f32 %v409_v60, 0.0 }
 0x3a3   :  { %v412_v62 = vadd.f32 1e-05, %v410_v61  ;;  %v990_v61 = vld [vmem:[#allocation9] ss:$0 sm:$0xff] }
 0x3a5   :  { %1206 = vrsqrt.f32 %v412_v62 }
 0x3af   :  { %v1207_v0 = vpop.eup %1206 }
 0x3b0   :  { %v414_v3 = vmul.f32 %v1207_v0, %v411_v63 }
 0x3b2   :  { %v422_v5 = vmul.f32 %v971_v2, %v414_v3 }
 0x3b4   :  { %v430_v7 = vadd.f32 %v972_v4, %v422_v5  ;;  %v1196_v5 = vld [vmem:[%s1900_s19] sm:$0xff]  }
 0x3b6   :  { %vm431_vm3 = vcmp.ge.f32.partialorder %v430_v7, 0.0  ;;  %v433_v8 = vmul.f32 %v432_v6, %v430_v7  ;;  %v1197_v6 = vld [vmem:[%s1900_s19 + $0x8] sm:$0xff]  }
 0x3b8   :  { %v434_v9 = vsel %vm431_vm3, %v430_v7, %v433_v8  ;;  %v1198_v7 = vld [vmem:[%s1900_s19 + $0x10] sm:$0xff]   ;;  %v1199_v8 = vld [vmem:[%s1900_s19 + $0x18] sm:$0xff]  }
 0x3b9   :  { %v435_v10 = vadd.f32 %v434_v9, %v287_v38  ;;  %v1192_v38 = vld [vmem:[%s1896_s15 + $0x20] sm:$0xff]  }
 0x3ba   :  { %v1200_v9 = vld [vmem:[%s1900_s19 + $0x20] sm:$0xff]  }
 0x3bb   :  { %v436_v11 = vpack.c.bf16 %v435_v10, %v435_v10  ;;  %v1201_v10 = vld [vmem:[%s1900_s19 + $0x28] sm:$0xff]  }
 0x3bd   :  { %1103 = vmatmul.mubr.bf16.vlgmr.msra.gmra.mrb[4].mxu0 %v436_v11  ;;  %v1202_v11 = vld [vmem:[%s1900_s19 + $0x30] sm:$0xff]  }
 0x3be   :  { %1150 = vmatprep.mubr.msk.bf16.mxu0 %vm1445_vm0, %v1444_v1  ;;  %1135 = vmatpush3.bf16.msra.mxu0 %v1196_v5 }
 0x3bf   :  { %1136 = vmatprep.subr.bf16.mxu0 %v1444_v1 }
 0x3c2   :  { %1137 = vmatpush3.bf16.msra.mxu0 %v1197_v6 }
 0x3c3   :  { %1138 = vmatprep.subr.bf16.mxu0 %v1444_v1 }
 0x3c6   :  { %1139 = vmatpush3.bf16.msra.mxu0 %v1198_v7 }
 0x3c7   :  { %1140 = vmatprep.subr.bf16.mxu0 %v1444_v1 }
 0x3ca   :  { %1141 = vmatpush3.bf16.msra.mxu0 %v1199_v8 }
 0x3cb   :  { %1142 = vmatprep.subr.bf16.mxu0 %v1444_v1 }
 0x3ce   :  { %1143 = vmatpush3.bf16.msra.mxu0 %v1200_v9 }
 0x3cf   :  { %1144 = vmatprep.subr.bf16.mxu0 %v1444_v1 }
 0x3d2   :  { %1145 = vmatpush3.bf16.msra.mxu0 %v1201_v10 }
 0x3d3   :  { %1146 = vmatprep.subr.bf16.mxu0 %v1444_v1 }
 0x3d6   :  { %1147 = vmatpush3.bf16.msra.mxu0 %v1202_v11 }
 0x3d7   :  { %1148 = vmatprep.subr.bf16.mxu0 %v1444_v1 }
 0x490   :  { %v542_v13 = vpop.f32.mrb[4].mxu0 }
 0x491   :  { %v543_v14 = vadd.f32 %v973_v12, %v542_v13  ;;  %v1104_v15 = vpop.f32.mrb[5].mxu0  ;;  %v1203_v12 = vld [vmem:[%s1900_s19 + $0x38] sm:$0xff]   ;;  %s1446_s19 = smov [#allocation16]  }
 0x492   :  { %v545_v16 = vpop.f32.mrb[6].mxu0  ;;  %1149 = vmatpush3.bf16.msra.mxu0 %v1203_v12  ;;  %s926_s21 = sshll.u32 %s1446_s19, 4  ;;  %s927_s21 = int_to_ptr.vmem [resolvable:$true] %s926_s21 }
 0x493   :  { %v1105_v17 = vpop.f32.mrb[7].mxu0  ;;  %v548_v18 = vmul.f32 %v543_v14, %v543_v14  ;;  %s1378_s12 = scalar_lea.vmem %s927_s21, 128  ;;  %p1383_p4 = scmp.lt.s32.totalorder %s927_s21, %s927_s21 }
 0x494   :  { %p1379_p3 = scmp.ne.s32.totalorder %s927_s21, %s1378_s12  ;;  %p1384_p5 = scmp.lt.s32.totalorder %s1378_s12, %s1378_s12 }
 0x495   :  { %v550_v19 = vsel %vm549_vm4, %v548_v18, 0.0 }
 0x496   :  { %551 = vadd.xlane.f32.xlu0 %v550_v19  ;;  %p1385_p6 = por %p1384_p5, %p1383_p4 }
 0x498   :  { %p1386_p7 = pnand %p1385_p6, %p1379_p3 }
 0x523   :  { %v552_v22 = vpop.xlane.xlu0 %551 }
 0x524   :  { %v553_v23 = vmax.f32 %v552_v22, 1e-24 }
 0x526   :  { %1208 = vrsqrt.f32 %v553_v23  ;;  %v999_v23 = vld [vmem:[#allocation11] ss:$0 sm:$0xff] }
 0x530   :  { %v1209_v24 = vpop.eup %1208 }
 0x531   :  { %v555_v25 = vmul.f32 %v1209_v24, %v543_v14 }
 0x533   :  { %556 = vst.msk [vmem:[#allocation16] sm:$0xff] %vm549_vm4, %v555_v25  ;;  %v558_v26 = vpack.c.bf16 %v555_v25, %v555_v25  ;;  %v1000_v25 = vld [vmem:[#allocation12] ss:$0 sm:$0xff] }
 0x535   :  { %1111 = vmatmul.mubr.msk.bf16.vlgmr.msra.gmra.mrb[4].mxu1 %vm549_vm4, %v558_v26 }
 0x536   :  { %1130 = vmatprep.mubr.msk.bf16.mxu1 %vm1445_vm0, %v1444_v1  ;;  %1115 = vmatpush3.bf16.msra.mxu1 %v1188_v34 }
 0x537   :  { %1116 = vmatprep.subr.bf16.mxu1 %v1444_v1 }
 0x53a   :  { %1117 = vmatpush3.bf16.msra.mxu1 %v1189_v35 }
 0x53b   :  { %1118 = vmatprep.subr.bf16.mxu1 %v1444_v1 }
 0x53e   :  { %1119 = vmatpush3.bf16.msra.mxu1 %v1190_v36 }
 0x53f   :  { %1120 = vmatprep.subr.bf16.mxu1 %v1444_v1 }
 0x542   :  { %1121 = vmatpush3.bf16.msra.mxu1 %v1191_v37 }
 0x543   :  { %1122 = vmatprep.subr.bf16.mxu1 %v1444_v1 }
 0x546   :  { %1123 = vmatpush3.bf16.msra.mxu1 %v1192_v38 }
 0x547   :  { %1124 = vmatprep.subr.bf16.mxu1 %v1444_v1 }
 0x54a   :  { %1125 = vmatpush3.bf16.msra.mxu1 %v1193_v39 }
 0x54b   :  { %1126 = vmatprep.subr.bf16.mxu1 %v1444_v1 }
 0x54e   :  { %1127 = vmatpush3.bf16.msra.mxu1 %v1194_v40 }
 0x54f   :  { %1128 = vmatprep.subr.bf16.mxu1 %v1444_v1 }
 0x552   :  { %1129 = vmatpush3.bf16.msra.mxu1 %v1195_v41 }
 0x608   :  { %v619_v28 = vpop.f32.mrb[4].mxu1 }
 0x609   :  { %v620_v29 = vadd.f32 %v983_v27, %v619_v28  ;;  %v1112_v30 = vpop.f32.mrb[5].mxu1  ;;  %v803_v27 = vstv %s989_s4 }
 0x60a   :  { %v622_v31 = vpop.f32.mrb[6].mxu1 }
 0x60b   :  { %625 = vadd.xlane.f32.xlu1 %v620_v29  ;;  %v1113_v32 = vpop.f32.mrb[7].mxu1  ;;  %v628_v33 = vmul.f32 %v620_v29, %v620_v29 }
 0x60d   :  { %629 = vadd.xlane.f32.xlu0 %v628_v33 }
 0x698   :  { %v626_v42 = vpop.xlane.xlu1 %625 }
 0x699   :  { %v627_v43 = vmul.f32 0.0078125, %v626_v42 }
 0x69a   :  { %v630_v44 = vpop.xlane.xlu0 %629 }
 0x69b   :  { %v632_v45 = vmul.f32 %v627_v43, %v627_v43  ;;  %v631_v46 = vmul.f32 0.0078125, %v630_v44  ;;  %v635_v50 = vsub.f32 %v620_v29, %v627_v43 }
 0x69d   :  { %v633_v47 = vsub.f32 %v631_v46, %v632_v45 }
 0x69f   :  { %v634_v48 = vmax.f32 %v633_v47, 0.0 }
 0x6a1   :  { %v636_v49 = vadd.f32 1e-05, %v634_v48 }
 0x6a3   :  { %1210 = vrsqrt.f32 %v636_v49 }
 0x6ad   :  { %v1211_v51 = vpop.eup %1210 }
 0x6ae   :  { %v638_v53 = vmul.f32 %v1211_v51, %v635_v50 }
 0x6b0   :  { %v646_v55 = vmul.f32 %v987_v52, %v638_v53 }
 0x6b2   :  { %v654_v57 = vadd.f32 %v988_v54, %v646_v55 }
 0x6b4   :  { %vm655_vm5 = vcmp.ge.f32.partialorder %v654_v57, 0.0  ;;  %v657_v58 = vmul.f32 %v656_v56, %v654_v57 }
 0x6b6   :  { %v658_v59 = vsel %vm655_vm5, %v654_v57, %v657_v58 }
 0x6b7   :  { %v660_v60 = vpack.c.bf16 %v658_v59, %v658_v59 }
 0x6b9   :  { %1131 = vmatmul.mubr.bf16.vlgmr.msra.gmra.mrb[8].mxu1 %v660_v60 }
 0x78c   :  { %v766_v62 = vpop.f32.mrb[8].mxu1 }
 0x78d   :  { %v767_v63 = vadd.f32 %v990_v61, %v766_v62  ;;  %v1132_v0 = vpop.f32.mrb[9].mxu1 }
 0x78e   :  { %v769_v2 = vpop.f32.mrb[10].mxu1 }
 0x78f   :  { %772 = vadd.xlane.f32.xlu1 %v767_v63  ;;  %v1133_v3 = vpop.f32.mrb[11].mxu1  ;;  %v775_v4 = vmul.f32 %v767_v63, %v767_v63 }
 0x791   :  { %776 = vadd.xlane.f32.xlu0 %v775_v4 }
 0x81c   :  { %v773_v13 = vpop.xlane.xlu1 %772 }
 0x81d   :  { %v774_v14 = vmul.f32 0.0078125, %v773_v13 }
 0x81e   :  { %v777_v15 = vpop.xlane.xlu0 %776 }
 0x81f   :  { %v779_v16 = vmul.f32 %v774_v14, %v774_v14  ;;  %v778_v17 = vmul.f32 0.0078125, %v777_v15  ;;  %v782_v21 = vsub.f32 %v767_v63, %v774_v14 }
 0x821   :  { %v780_v18 = vsub.f32 %v778_v17, %v779_v16 }
 0x823   :  { %v781_v19 = vmax.f32 %v780_v18, 0.0 }
 0x825   :  { %v783_v20 = vadd.f32 1e-05, %v781_v19 }
 0x827   :  { %1212 = vrsqrt.f32 %v783_v20 }
 0x831   :  { %v1213_v22 = vpop.eup %1212 }
 0x832   :  { %v785_v24 = vmul.f32 %v1213_v22, %v782_v21 }
 0x834   :  { %v793_v26 = vmul.f32 %v999_v23, %v785_v24 }
 0x836   :  { %v801_v28 = vadd.f32 %v1000_v25, %v793_v26 }
 0x838   :  { %vm802_vm6 = vcmp.ge.f32.partialorder %v801_v28, 0.0  ;;  %v804_v1 = vmul.f32 %v803_v27, %v801_v28 }
 0x83a   :  { %v805_v29 = vsel %vm802_vm6, %v801_v28, %v804_v1 }
 0x83b   :  { %v806_v30 = vadd.f32 %v805_v29, %v658_v59 }
 0x83d   :  { %v807_v31 = vpack.c.bf16 %v806_v30, %v806_v30 }
 0x83f   :  { %1151 = vmatmul.mubr.bf16.vlgmr.msra.gmra.mrb[8].mxu0 %v807_v31 }
 0x840   :  { %1389 = shalt.err (!%p1386_p7)
}
 0x841   :  { %s1390_s5 = scalar_lea.hbm %s1903_s22, 128 }
 0x842   :  { %p1391_p8 = scmp.ne.s32.totalorder %s1903_s22, %s1390_s5  ;;  %p1394_p9 = scmp.lt.u32.totalorder %s1390_s5, %s1903_s22 }
 0x844   :  { %p1396_p10 = pnand %p1394_p9, %p1391_p8 }
 0x846   :  { %1399 = shalt.err (!%p1396_p10)
}
 0x847   :  { %929 = dma.vmem_to_hbm [thread:$0]  %s927_s21, 128, %s1903_s22, [#allocation4]   ;;  %v1001_v32 = vld [vmem:[#allocation14] ss:$0 sm:$0xff] }
 0x848   :  { %s1447_s15 = smov [#allocation17]  }
 0x849   :  { %s936_s2 = sshll.u32 %s1447_s15, 4  ;;  %s937_s2 = int_to_ptr.vmem [resolvable:$true] %s936_s2 }
 0x84a   :  { %s1400_s9 = scalar_lea.vmem %s937_s2, 128  ;;  %p1405_p12 = scmp.lt.s32.totalorder %s937_s2, %s937_s2 }
 0x84b   :  { %p1401_p11 = scmp.ne.s32.totalorder %s937_s2, %s1400_s9  ;;  %p1406_p13 = scmp.lt.s32.totalorder %s1400_s9, %s1400_s9 }
 0x84d   :  { %p1407_p0 = por %p1406_p13, %p1405_p12 }
 0x84f   :  { %p1408_p1 = pnand %p1407_p0, %p1401_p11 }
 0x912   :  { %v913_v33 = vpop.f32.mrb[8].mxu0 }
 0x913   :  { %v914_v34 = vadd.f32 %v1001_v32, %v913_v33  ;;  %v1152_v35 = vpop.f32.mrb[9].mxu0 }
 0x914   :  { %v916_v36 = vpop.f32.mrb[10].mxu0 }
 0x915   :  { %919 = vst.msk [vmem:[#allocation17] sm:$0xff] %vm209_vm1, %v914_v34  ;;  %v1153_v37 = vpop.f32.mrb[11].mxu0 }
 0x916   :  { %1411 = shalt.err (!%p1408_p1)
}
 0x917   :  { %s1412_s27 = scalar_lea.hbm %s1904_s23, 128 }
 0x918   :  { %p1413_p2 = scmp.ne.s32.totalorder %s1904_s23, %s1412_s27  ;;  %p1416_p3 = scmp.lt.u32.totalorder %s1412_s27, %s1904_s23 }
 0x91a   :  { %p1418_p4 = pnand %p1416_p3, %p1413_p2 }
 0x91c   :  { %1421 = shalt.err (!%p1418_p4)
}
 0x91d   :  { %939 = dma.vmem_to_hbm [thread:$0]  %s937_s2, 128, %s1904_s23, [#allocation18]  }
 0x91e   :  { %1432 = dma.done.wait [#allocation4], 128  }
 0x91f   :  { %1433 = vsyncadd [#allocation4], 4294967168 }
 0x920   :  { %1434 = dma.done.wait [#allocation18], 128  }
 0x921   :  { %1435 = vsyncadd [#allocation18], 4294967168 }
 0x922   :  { %946 = vsyncpa [#allocation3], 1 }
 0x923   :  { %947 = vsyncpa [#allocation7], 1 }
 0x924   :  { %948 = vsyncpa [#allocation10], 1 }
 0x925   :  { %949 = vsyncpa [#allocation13], 1 }
 0x926   :  { %950 = vsyncpa [#allocation4], 1 }
 0x927   :  { %951 = vsyncpa [#allocation18], 1 }
 0x928   :  { %952 = vsyncpa [#allocation5], 1 }

</bundles_post_ra>
